<compile_context>
chip_gen: v6e
topology: v6e:2x2x1
jax: 0.10.0
libtpu: 0.0.40
codegen_flags: <defaults>
</compile_context>

<pallas_src>
import jax
import jax.numpy as jnp
from jax.experimental import pallas as pl
from jax.experimental.pallas import tpu as pltpu

EPS = 1e-5


def _round_up(v, m):
    return ((v + m - 1) // m) * m


def _cdiv(a, b):
    return (a + b - 1) // b


def classblock_kernel(x_ref, w1_ref, b1_ref, w2_ref, b2_ref, out_ref, f_ref):
    # Bottleneck features (Linear1 with eval-BN folded in): computed once per
    # row tile (first class tile only), cached in VMEM, reused for all class
    # tiles.  NOTE: relies on grid axis 1 being "arbitrary" (iterated innermost,
    # j == 0 first); do not mark it parallel without removing this caching.
    @pl.when(pl.program_id(1) == 0)
    def _():
        f = jnp.dot(x_ref[...], w1_ref[...], preferred_element_type=jnp.float32)
        f_ref[...] = (f + b1_ref[...]).astype(f_ref.dtype)

    logits = jnp.dot(f_ref[...], w2_ref[...], preferred_element_type=jnp.float32)
    out_ref[...] = (logits + b2_ref[...]).astype(out_ref.dtype)


def prepare_params(params, *, eps=EPS):
    """One-time (per weight set) preparation, hoisted out of the per-call path:
    fold eval-mode BatchNorm into Linear1 (exact), cast MXU operands to bf16,
    and lane-pad the classifier dim to a multiple of 128."""
    s = params["gamma"] * jax.lax.rsqrt(params["running_var"] + eps)        # (1, NB)
    w1 = (params["w1"] * s).astype(jnp.bfloat16)                            # (D, NB)
    b1 = ((params["b1"] - params["running_mean"]) * s
          + params["beta"]).astype(jnp.float32)                             # (1, NB)
    w2 = params["w2"].astype(jnp.bfloat16)                                  # (NB, C)
    b2 = params["b2"].astype(jnp.float32)                                   # (1, C)
    C = w2.shape[1]
    Cp = _round_up(C, 128)                                                  # lane-dense stores
    if Cp != C:
        w2 = jnp.pad(w2, ((0, 0), (0, Cp - C)))
        b2 = jnp.pad(b2, ((0, 0), (0, Cp - C)))
    return dict(w1=w1, b1=b1, w2=w2, b2=b2, class_num=C)


def class_block(x, prepared, *, block_b=512, block_c=512,
                single_buffer_weights=True, out_dtype=jnp.float32):
    """x: [B, input_dim]. prepared: output of prepare_params()."""
    B, D = x.shape
    NB = prepared["w1"].shape[1]
    C = prepared["class_num"]
    Cp0 = prepared["w2"].shape[1]
    assert D % 128 == 0 and NB % 128 == 0, \
        "input_dim / num_bottleneck are expected to be multiples of 128"

    # ---- tiling -------------------------------------------------------------
    # Rows: balanced tiles (minimise dead-row padding); keep >=2 row tiles when
    # B is large enough so the "parallel" axis can shard across 2 TCs (v7x).
    n_row = max(1, _cdiv(B, block_b))
    if B >= 32:
        n_row = max(n_row, 2)
    block_b = _round_up(_cdiv(B, n_row), 16)
    Bp = n_row * block_b

    # Classes: balanced multiples of 128; big tiles amortise the ~0.35 us
    # per-grid-step overhead (the class loop is step-overhead-bound, not BW-bound).
    n_cls = max(1, _cdiv(Cp0, block_c))
    block_c = _round_up(_cdiv(Cp0, n_cls), 128)
    Cp = n_cls * block_c

    xb = x.astype(jnp.bfloat16)
    if Bp != B:
        xb = jnp.pad(xb, ((0, Bp - B), (0, 0)))
    w2, b2 = prepared["w2"], prepared["b2"]
    if Cp != Cp0:  # only for awkward class counts; usually a no-op
        w2 = jnp.pad(w2, ((0, 0), (0, Cp - Cp0)))
        b2 = jnp.pad(b2, ((0, 0), (0, Cp - Cp0)))

    grid = (n_row, n_cls)

    # ---- VMEM budget: actual tile set + headroom, capped below v7x's 64 MiB --
    def tile_bytes(single_buf):
        w_bufs = 1 if single_buf else 2
        return (2 * block_b * D * 2            # x row tile (bf16, double-buffered)
                + w_bufs * D * NB * 2          # BN-folded W1 (bf16)
                + w_bufs * NB * 4              # BN-folded b1 (f32)
                + 2 * NB * block_c * 2         # W2 class tile (bf16, double-buffered)
                + 2 * block_c * 4              # b2 class tile
                + 2 * block_b * block_c * 4    # out tile (f32, double-buffered)
                + block_b * NB * 2)            # f scratch (bf16)

    cost = pl.CostEstimate(
        flops=2 * Bp * D * NB + 2 * Bp * NB * Cp,
        transcendentals=0,
        bytes_accessed=(Bp * D * 2 + D * NB * 2 + NB * 4
                        + n_row * (NB * Cp * 2 + Cp * 4)   # W2 re-streamed per row tile
                        + Bp * Cp * 4),
    )

    def make_call(single_buf):
        w_kwargs = dict(pipeline_mode=pl.Buffered(1)) if single_buf else {}
        vmem_limit = int(min(56 * 1024 * 1024,
                             max(32 * 1024 * 1024,
                                 tile_bytes(single_buf) + 8 * 1024 * 1024)))
        return pl.pallas_call(
            classblock_kernel,
            out_shape=jax.ShapeDtypeStruct((Bp, Cp), out_dtype),
            grid=grid,
            in_specs=[
                pl.BlockSpec((block_b, D), lambda i, j: (i, 0)),             # x row tile
                pl.BlockSpec((D, NB), lambda i, j: (0, 0), **w_kwargs),      # BN-folded W1
                pl.BlockSpec((1, NB), lambda i, j: (0, 0), **w_kwargs),      # BN-folded b1
                pl.BlockSpec((NB, block_c), lambda i, j: (0, j)),            # W2 class tile
                pl.BlockSpec((1, block_c), lambda i, j: (0, j)),             # b2 class tile
            ],
            out_specs=pl.BlockSpec((block_b, block_c), lambda i, j: (i, j)),
            scratch_shapes=[pltpu.VMEM((block_b, NB), jnp.bfloat16)],
            compiler_params=pltpu.CompilerParams(
                dimension_semantics=("parallel", "arbitrary"),
                vmem_limit_bytes=vmem_limit,
            ),
            cost_estimate=cost,
        )

    try:
        out = make_call(single_buffer_weights)(xb, prepared["w1"], prepared["b1"], w2, b2)
    except Exception:
        # Fallback if this jax build rejects pipeline_mode=pl.Buffered(1);
        # it is a pure VMEM-footprint optimisation, numerics are identical.
        if not single_buffer_weights:
            raise
        out = make_call(False)(xb, prepared["w1"], prepared["b1"], w2, b2)

    return out[:B, :C]


def init_params(key, input_dim, num_bottleneck, class_num):
    """Deterministic init matching weights_init_kaiming / weights_init_classifier."""
    k1, k2, k3 = jax.random.split(key, 3)
    # Linear1: kaiming_normal_(a=0, mode='fan_out') -> std = sqrt(2 / fan_out)
    std1 = (2.0 / num_bottleneck) ** 0.5
    w1 = jax.random.normal(k1, (input_dim, num_bottleneck), jnp.float32) * std1
    b1 = jnp.zeros((1, num_bottleneck), jnp.float32)
    # BatchNorm1d: weight ~ N(1, 0.02), bias = 0, running stats (0, 1)
    gamma = 1.0 + 0.02 * jax.random.normal(k2, (1, num_bottleneck), jnp.float32)
    beta = jnp.zeros((1, num_bottleneck), jnp.float32)
    running_mean = jnp.zeros((1, num_bottleneck), jnp.float32)
    running_var = jnp.ones((1, num_bottleneck), jnp.float32)
    # Classifier Linear: weight ~ N(0, 0.001), bias = 0
    w2 = 0.001 * jax.random.normal(k3, (num_bottleneck, class_num), jnp.float32)
    b2 = jnp.zeros((1, class_num), jnp.float32)
    return dict(w1=w1, b1=b1, gamma=gamma, beta=beta,
                running_mean=running_mean, running_var=running_var,
                w2=w2, b2=b2)


def class_block_ref(x, p):
    """Pure-f32 reference with the original (unfolded) BN formulation."""
    f = x @ p["w1"] + p["b1"]
    y = (f - p["running_mean"]) * jax.lax.rsqrt(p["running_var"] + EPS) * p["gamma"] + p["beta"]
    return y @ p["w2"] + p["b2"]


if __name__ == "__main__":
    # Small shapes: batch=8, input_dim=256, num_bottleneck=256, class_num=75
    # (class_num deliberately not a multiple of 128 to exercise lane padding).
    B, INPUT_DIM, NUM_BOTTLENECK, CLASS_NUM = 8, 256, 256, 75

    key = jax.random.PRNGKey(0)
    kx, kp = jax.random.split(key)
    x = jax.random.normal(kx, (B, INPUT_DIM), jnp.float32)
    params = init_params(kp, INPUT_DIM, NUM_BOTTLENECK, CLASS_NUM)

    prepared = prepare_params(params)          # hoisted out of the per-call path
    out = jax.block_until_ready(class_block(x, prepared))
    ref = class_block_ref(x, params)

    assert out.shape == (B, CLASS_NUM)
    # bf16 MXU inputs with f32 accumulation -> loose tolerance vs f32 reference.
    max_abs_err = float(jnp.max(jnp.abs(out - ref)))
    assert jnp.allclose(out, ref, atol=5e-3, rtol=5e-2), max_abs_err

    print("KERNEL_OK")
</pallas_src>

<mosaic_0001>
module attributes {stable_mosaic.version = 11 : i64} {
  func.func @classblock_kernel(%arg0: i32, %arg1: i32, %arg2: memref<16x256xbf16, #tpu.memory_space<vmem>>, %arg3: memref<256x256xbf16, #tpu.memory_space<vmem>>, %arg4: memref<1x256xf32, #tpu.memory_space<vmem>>, %arg5: memref<256x128xbf16, #tpu.memory_space<vmem>>, %arg6: memref<1x128xf32, #tpu.memory_space<vmem>>, %arg7: memref<16x128xf32, #tpu.memory_space<vmem>>, %arg8: memref<16x256xbf16, #tpu.memory_space<vmem>>) attributes {dimension_semantics = [#tpu.dimension_semantics<parallel>, #tpu.dimension_semantics<arbitrary>], iteration_bounds = array<i64: 1, 1>, scalar_prefetch = 0 : i64, scratch_operands = 1 : i64, tpu.core_type = #tpu.core_type<tc>, window_params = [{transform_indices = @transform_0, window_bounds = array<i64: 16, 256>}, {pipeline_mode = #tpu.pipeline_mode<synchronous>, transform_indices = @transform_1, window_bounds = array<i64: 256, 256>}, {pipeline_mode = #tpu.pipeline_mode<synchronous>, transform_indices = @transform_2, window_bounds = array<i64: 1, 256>}, {transform_indices = @transform_3, window_bounds = array<i64: 256, 128>}, {transform_indices = @transform_4, window_bounds = array<i64: 1, 128>}, {transform_indices = @transform_5, window_bounds = array<i64: 16, 128>}]} {
    %c0_i32 = arith.constant 0 : i32
    %0 = arith.cmpi eq, %arg1, %c0_i32 : i32
    %1 = arith.extui %0 : i1 to i32
    %c0_i32_0 = arith.constant 0 : i32
    %2 = arith.cmpi ne, %1, %c0_i32_0 : i32
    scf.if %2 {
      %c0_8 = arith.constant 0 : index
      %c0_9 = arith.constant 0 : index
      %10 = vector.load %arg2[%c0_8, %c0_9] : memref<16x256xbf16, #tpu.memory_space<vmem>>, vector<16x256xbf16>
      %c0_10 = arith.constant 0 : index
      %c0_11 = arith.constant 0 : index
      %11 = vector.load %arg3[%c0_10, %c0_11] : memref<256x256xbf16, #tpu.memory_space<vmem>>, vector<256x256xbf16>
      %cst_12 = arith.constant dense<0.000000e+00> : vector<16x256xf32>
      %12 = tpu.matmul %10, %11, %cst_12 {dimension_numbers = #tpu.dot_dimension_numbers<[1], [0], [0], [1], [0, 0, 1, 1], [], []>} : vector<16x256xbf16>, vector<256x256xbf16>, vector<16x256xf32> -> vector<16x256xf32>
      %c0_13 = arith.constant 0 : index
      %c0_14 = arith.constant 0 : index
      %13 = vector.load %arg4[%c0_13, %c0_14] : memref<1x256xf32, #tpu.memory_space<vmem>>, vector<1x256xf32>
      %14 = vector.broadcast %13 : vector<1x256xf32> to vector<16x256xf32>
      %15 = arith.addf %12, %14 : vector<16x256xf32>
      %16 = arith.truncf %15 : vector<16x256xf32> to vector<16x256xbf16>
      %c0_15 = arith.constant 0 : index
      %c0_16 = arith.constant 0 : index
      %17 = vector.load %arg8[%c0_15, %c0_16] : memref<16x256xbf16, #tpu.memory_space<vmem>>, vector<16x256xbf16>
      tpu.vector_store %arg8[%c0_15, %c0_16], %16 {strides = array<i32>} : memref<16x256xbf16, #tpu.memory_space<vmem>>, vector<16x256xbf16>,
    } else {
    }
    %c0 = arith.constant 0 : index
    %c0_1 = arith.constant 0 : index
    %3 = vector.load %arg8[%c0, %c0_1] : memref<16x256xbf16, #tpu.memory_space<vmem>>, vector<16x256xbf16>
    %c0_2 = arith.constant 0 : index
    %c0_3 = arith.constant 0 : index
    %4 = vector.load %arg5[%c0_2, %c0_3] : memref<256x128xbf16, #tpu.memory_space<vmem>>, vector<256x128xbf16>
    %cst = arith.constant dense<0.000000e+00> : vector<16x128xf32>
    %5 = tpu.matmul %3, %4, %cst {dimension_numbers = #tpu.dot_dimension_numbers<[1], [0], [0], [1], [0, 0, 1, 1], [], []>} : vector<16x256xbf16>, vector<256x128xbf16>, vector<16x128xf32> -> vector<16x128xf32>
    %c0_4 = arith.constant 0 : index
    %c0_5 = arith.constant 0 : index
    %6 = vector.load %arg6[%c0_4, %c0_5] : memref<1x128xf32, #tpu.memory_space<vmem>>, vector<1x128xf32>
    %7 = vector.broadcast %6 : vector<1x128xf32> to vector<16x128xf32>
    %8 = arith.addf %5, %7 : vector<16x128xf32>
    %c0_6 = arith.constant 0 : index
    %c0_7 = arith.constant 0 : index
    %9 = vector.load %arg7[%c0_6, %c0_7] : memref<16x128xf32, #tpu.memory_space<vmem>>, vector<16x128xf32>
    tpu.vector_store %arg7[%c0_6, %c0_7], %8 {strides = array<i32>} : memref<16x128xf32, #tpu.memory_space<vmem>>, vector<16x128xf32>,
    return
  }
  func.func @transform_0(%arg0: i32, %arg1: i32) -> (i32, i32) {
    %c0_i32 = arith.constant 0 : i32
    %c0_i32_0 = arith.constant 0 : i32
    return %arg0, %c0_i32 : i32, i32
  }
  func.func @transform_1(%arg0: i32, %arg1: i32) -> (i32, i32) {
    %c0_i32 = arith.constant 0 : i32
    %c0_i32_0 = arith.constant 0 : i32
    %c0_i32_1 = arith.constant 0 : i32
    return %c0_i32, %c0_i32_0 : i32, i32
  }
  func.func @transform_2(%arg0: i32, %arg1: i32) -> (i32, i32) {
    %c0_i32 = arith.constant 0 : i32
    %c0_i32_0 = arith.constant 0 : i32
    %c0_i32_1 = arith.constant 0 : i32
    return %c0_i32, %c0_i32_0 : i32, i32
  }
  func.func @transform_3(%arg0: i32, %arg1: i32) -> (i32, i32) {
    %c0_i32 = arith.constant 0 : i32
    %c0_i32_0 = arith.constant 0 : i32
    return %c0_i32, %arg1 : i32, i32
  }
  func.func @transform_4(%arg0: i32, %arg1: i32) -> (i32, i32) {
    %c0_i32 = arith.constant 0 : i32
    %c0_i32_0 = arith.constant 0 : i32
    return %c0_i32, %arg1 : i32, i32
  }
  func.func @transform_5(%arg0: i32, %arg1: i32) -> (i32, i32) {
    %c0_i32 = arith.constant 0 : i32
    return %arg0, %arg1 : i32, i32
  }
}

module attributes {stable_mosaic.version = 11 : i64} {
  func.func @classblock_kernel(%arg0: i32, %arg1: i32, %arg2: memref<16x256xbf16, #tpu.memory_space<vmem>>, %arg3: memref<256x256xbf16, #tpu.memory_space<vmem>>, %arg4: memref<1x256xf32, #tpu.memory_space<vmem>>, %arg5: memref<256x128xbf16, #tpu.memory_space<vmem>>, %arg6: memref<1x128xf32, #tpu.memory_space<vmem>>, %arg7: memref<16x128xf32, #tpu.memory_space<vmem>>, %arg8: memref<16x256xbf16, #tpu.memory_space<vmem>>) attributes {dimension_semantics = [#tpu.dimension_semantics<parallel>, #tpu.dimension_semantics<arbitrary>], iteration_bounds = array<i64: 1, 1>, scalar_prefetch = 0 : i64, scratch_operands = 1 : i64, tpu.core_type = #tpu.core_type<tc>, window_params = [{transform_indices = @transform_0, window_bounds = array<i64: 16, 256>}, {pipeline_mode = #tpu.pipeline_mode<synchronous>, transform_indices = @transform_1, window_bounds = array<i64: 256, 256>}, {pipeline_mode = #tpu.pipeline_mode<synchronous>, transform_indices = @transform_2, window_bounds = array<i64: 1, 256>}, {transform_indices = @transform_3, window_bounds = array<i64: 256, 128>}, {transform_indices = @transform_4, window_bounds = array<i64: 1, 128>}, {transform_indices = @transform_5, window_bounds = array<i64: 16, 128>}]} {
    %c0_i32 = arith.constant 0 : i32
    %0 = arith.cmpi eq, %arg1, %c0_i32 : i32
    %1 = arith.extui %0 : i1 to i32
    %c0_i32_0 = arith.constant 0 : i32
    %2 = arith.cmpi ne, %1, %c0_i32_0 : i32
    scf.if %2 {
      %c0_8 = arith.constant 0 : index
      %c0_9 = arith.constant 0 : index
      %10 = vector.load %arg2[%c0_8, %c0_9] : memref<16x256xbf16, #tpu.memory_space<vmem>>, vector<16x256xbf16>
      %c0_10 = arith.constant 0 : index
      %c0_11 = arith.constant 0 : index
      %11 = vector.load %arg3[%c0_10, %c0_11] : memref<256x256xbf16, #tpu.memory_space<vmem>>, vector<256x256xbf16>
      %cst_12 = arith.constant dense<0.000000e+00> : vector<16x256xf32>
      %12 = tpu.matmul %10, %11, %cst_12 {dimension_numbers = #tpu.dot_dimension_numbers<[1], [0], [0], [1], [0, 0, 1, 1], [], []>} : vector<16x256xbf16>, vector<256x256xbf16>, vector<16x256xf32> -> vector<16x256xf32>
      %c0_13 = arith.constant 0 : index
      %c0_14 = arith.constant 0 : index
      %13 = vector.load %arg4[%c0_13, %c0_14] : memref<1x256xf32, #tpu.memory_space<vmem>>, vector<1x256xf32>
      %14 = vector.broadcast %13 : vector<1x256xf32> to vector<16x256xf32>
      %15 = arith.addf %12, %14 : vector<16x256xf32>
      %16 = arith.truncf %15 : vector<16x256xf32> to vector<16x256xbf16>
      %c0_15 = arith.constant 0 : index
      %c0_16 = arith.constant 0 : index
      %17 = vector.load %arg8[%c0_15, %c0_16] : memref<16x256xbf16, #tpu.memory_space<vmem>>, vector<16x256xbf16>
      tpu.vector_store %arg8[%c0_15, %c0_16], %16 {strides = array<i32>} : memref<16x256xbf16, #tpu.memory_space<vmem>>, vector<16x256xbf16>,
    } else {
    }
    %c0 = arith.constant 0 : index
    %c0_1 = arith.constant 0 : index
    %3 = vector.load %arg8[%c0, %c0_1] : memref<16x256xbf16, #tpu.memory_space<vmem>>, vector<16x256xbf16>
    %c0_2 = arith.constant 0 : index
    %c0_3 = arith.constant 0 : index
    %4 = vector.load %arg5[%c0_2, %c0_3] : memref<256x128xbf16, #tpu.memory_space<vmem>>, vector<256x128xbf16>
    %cst = arith.constant dense<0.000000e+00> : vector<16x128xf32>
    %5 = tpu.matmul %3, %4, %cst {dimension_numbers = #tpu.dot_dimension_numbers<[1], [0], [0], [1], [0, 0, 1, 1], [], []>} : vector<16x256xbf16>, vector<256x128xbf16>, vector<16x128xf32> -> vector<16x128xf32>
    %c0_4 = arith.constant 0 : index
    %c0_5 = arith.constant 0 : index
    %6 = vector.load %arg6[%c0_4, %c0_5] : memref<1x128xf32, #tpu.memory_space<vmem>>, vector<1x128xf32>
    %7 = vector.broadcast %6 : vector<1x128xf32> to vector<16x128xf32>
    %8 = arith.addf %5, %7 : vector<16x128xf32>
    %c0_6 = arith.constant 0 : index
    %c0_7 = arith.constant 0 : index
    %9 = vector.load %arg7[%c0_6, %c0_7] : memref<16x128xf32, #tpu.memory_space<vmem>>, vector<16x128xf32>
    tpu.vector_store %arg7[%c0_6, %c0_7], %8 {strides = array<i32>} : memref<16x128xf32, #tpu.memory_space<vmem>>, vector<16x128xf32>,
    return
  }
  func.func @transform_0(%arg0: i32, %arg1: i32) -> (i32, i32) {
    %c0_i32 = arith.constant 0 : i32
    %c0_i32_0 = arith.constant 0 : i32
    return %arg0, %c0_i32 : i32, i32
  }
  func.func @transform_1(%arg0: i32, %arg1: i32) -> (i32, i32) {
    %c0_i32 = arith.constant 0 : i32
    %c0_i32_0 = arith.constant 0 : i32
    %c0_i32_1 = arith.constant 0 : i32
    return %c0_i32, %c0_i32_0 : i32, i32
  }
  func.func @transform_2(%arg0: i32, %arg1: i32) -> (i32, i32) {
    %c0_i32 = arith.constant 0 : i32
    %c0_i32_0 = arith.constant 0 : i32
    %c0_i32_1 = arith.constant 0 : i32
    return %c0_i32, %c0_i32_0 : i32, i32
  }
  func.func @transform_3(%arg0: i32, %arg1: i32) -> (i32, i32) {
    %c0_i32 = arith.constant 0 : i32
    %c0_i32_0 = arith.constant 0 : i32
    return %c0_i32, %arg1 : i32, i32
  }
  func.func @transform_4(%arg0: i32, %arg1: i32) -> (i32, i32) {
    %c0_i32 = arith.constant 0 : i32
    %c0_i32_0 = arith.constant 0 : i32
    return %c0_i32, %arg1 : i32, i32
  }
  func.func @transform_5(%arg0: i32, %arg1: i32) -> (i32, i32) {
    %c0_i32 = arith.constant 0 : i32
    return %arg0, %arg1 : i32, i32
  }
}

</mosaic_0001>

<bundles_post_ra>
// kernel: tpu_custom_call.1
= control target key start
LH: loop header
LB: loop body
LE: loop exit
PB: predicated region body
PF: predicated region fallthrough
CT: control target
= control target key end

     0   :  { %10 = vsyncpa [#allocation4], 0  ;;  %s855_s0 = inlined_call_operand.hbm [shape: bf16[16,256], index: 0, kind: input, shape index: {}]   ;;  %s856_s1 = inlined_call_operand.hbm [shape: bf16[256,256], index: 1, kind: input, shape index: {}]   ;;  %s857_s2 = inlined_call_operand.vmem [shape: f32[1,256], index: 2, kind: input, shape index: {}]   ;;  %s858_s3 = inlined_call_operand.hbm [shape: bf16[256,128], index: 3, kind: input, shape index: {}]   ;;  %s859_s4 = inlined_call_operand.vmem [shape: f32[1,128], index: 4, kind: input, shape index: {}]   ;;  %s860_s5 = inlined_call_operand.hbm [shape: f32[16,128], index: 5, kind: output, shape index: {}]  }
   0x1   :  { %11 = vsyncpa [#allocation7], 0 }
   0x2   :  { %12 = vsyncpa [#allocation5], 0  ;;  %s790_s18 = smov [#allocation6]   ;;  %s791_s20 = smov [#allocation3]  }
   0x3   :  { %s30_s19 = sshll.u32 %s790_s18, 4  ;;  %s18_s21 = sshll.u32 %s791_s20, 4  ;;  %s31_s19 = int_to_ptr.vmem [resolvable:$true] %s30_s19  ;;  %s19_s21 = int_to_ptr.vmem [resolvable:$true] %s18_s21 }
   0x4   :  { %s712_s22 = scalar_lea.vmem %s31_s19, 4096  ;;  %p717_p1 = scmp.lt.s32.totalorder %s31_s19, %s31_s19 }
   0x5   :  { %p713_p0 = scmp.ne.s32.totalorder %s31_s19, %s712_s22  ;;  %p718_p2 = scmp.lt.s32.totalorder %s712_s22, %s712_s22 }
   0x7   :  { %p719_p3 = por %p718_p2, %p717_p1 }
   0x9   :  { %p720_p4 = pnand %p719_p3, %p713_p0 }
   0xb   :  { %723 = shalt.err (!%p720_p4)
}
   0xc   :  { %s792_s23 = smov 128   ;;  %s793_s24 = smov 8  }
   0xd   :  { %36 = dma.hbm_to_vmem [thread:$0]  %s856_s1, 4096, %s31_s19, [#allocation7], %s792_s23, %s792_s23, %s793_s24  }
   0xe   :  { %s732_s27 = scalar_lea.vmem %s19_s21, 256  ;;  %p737_p6 = scmp.lt.s32.totalorder %s19_s21, %s19_s21 }
   0xf   :  { %p733_p5 = scmp.ne.s32.totalorder %s19_s21, %s732_s27  ;;  %p738_p7 = scmp.lt.s32.totalorder %s732_s27, %s732_s27 }
  0x11   :  { %p739_p8 = por %p738_p7, %p737_p6 }
  0x13   :  { %p740_p9 = pnand %p739_p8, %p733_p5 }
  0x15   :  { %743 = shalt.err (!%p740_p9)
}
  0x16   :  { %24 = dma.hbm_to_vmem [thread:$0]  %s855_s0, 256, %s19_s21, [#allocation4], %s792_s23, %s792_s23, %s793_s24  }
  0x17   :  { %s794_s30 = smov [#allocation8]  }
  0x18   :  { %s44_s6 = sshll.u32 %s794_s30, 4  ;;  %s45_s6 = int_to_ptr.vmem [resolvable:$true] %s44_s6 }
  0x19   :  { %s752_s7 = scalar_lea.vmem %s45_s6, 2048  ;;  %p757_p11 = scmp.lt.s32.totalorder %s45_s6, %s45_s6 }
  0x1a   :  { %p753_p10 = scmp.ne.s32.totalorder %s45_s6, %s752_s7  ;;  %p758_p12 = scmp.lt.s32.totalorder %s752_s7, %s752_s7 }
  0x1c   :  { %p759_p13 = por %p758_p12, %p757_p11 }
  0x1e   :  { %p760_p0 = pnand %p759_p13, %p753_p10 }
  0x20   :  { %763 = shalt.err (!%p760_p0)
}
  0x21   :  { %s795_s1 = smov 64   ;;  %s796_s8 = smov 4  }
  0x22   :  { %50 = dma.hbm_to_vmem [thread:$0]  %s858_s3, 2048, %s45_s6, [#allocation7], %s795_s1, %s795_s1, %s796_s8  }
  0x23   :  { %784 = dma.done.wait [#allocation4], 256  }
  0x24   :  { %785 = vsyncadd [#allocation4], 4294967040 }
  0x25   :  { %786 = dma.done.wait [#allocation7], 6144  }
  0x26   :  { %787 = vsyncadd [#allocation7], 4294961152  ;;  %v637_v0 = vld [vmem:[#allocation6 + $0x74] ss:$8 sps:$4 sm:$0xff]   ;;  %v639_v1 = vld [vmem:[#allocation6 + $0x70] ss:$8 sps:$4 sm:$0xff]   ;;  %v103_v50 = vlaneseq }
  0x27   :  { %283 = vmatprep.subr.bf16.mxu0 %v637_v0  ;;  %v640_v2 = vld [vmem:[#allocation6 + $0x64] ss:$8 sps:$4 sm:$0xff]   ;;  %v642_v3 = vld [vmem:[#allocation6 + $0x60] ss:$8 sps:$4 sm:$0xff]   ;;  %v643_v4 = vld [vmem:[#allocation6 + $0x54] ss:$8 sps:$4 sm:$0xff]  }
  0x28   :  { %284 = vmatpush1.bf16.msra.mxu0 %v639_v1  ;;  %v645_v5 = vld [vmem:[#allocation6 + $0x50] ss:$8 sps:$4 sm:$0xff]   ;;  %v646_v6 = vld [vmem:[#allocation6 + $0x44] ss:$8 sps:$4 sm:$0xff]   ;;  %v648_v7 = vld [vmem:[#allocation6 + $0x40] ss:$8 sps:$4 sm:$0xff]  }
  0x29   :  { %285 = vmatprep.subr.bf16.mxu0 %v640_v2  ;;  %v649_v8 = vld [vmem:[#allocation6 + $0x34] ss:$8 sps:$4 sm:$0xff]   ;;  %v651_v9 = vld [vmem:[#allocation6 + $0x30] ss:$8 sps:$4 sm:$0xff]   ;;  %v652_v10 = vld [vmem:[#allocation6 + $0x24] ss:$8 sps:$4 sm:$0xff]  }
  0x2a   :  { %v654_v11 = vld [vmem:[#allocation6 + $0x20] ss:$8 sps:$4 sm:$0xff]   ;;  %v655_v12 = vld [vmem:[#allocation6 + $0x14] ss:$8 sps:$4 sm:$0xff]   ;;  %v657_v13 = vld [vmem:[#allocation6 + $0x10] ss:$8 sps:$4 sm:$0xff]  }
  0x2b   :  { %v658_v14 = vld [vmem:[#allocation6 + $0x4] ss:$8 sps:$4 sm:$0xff]   ;;  %v687_v15 = vld [vmem:[#allocation3 + $0x4] ss:$8 sps:$4 sm:$0xff]   ;;  %v660_v18 = vld [vmem:[#allocation6] ss:$8 sps:$4 sm:$0xff]  }
  0x2c   :  { %286 = vmatpush1.bf16.msra.mxu0 %v642_v3  ;;  %v688_v16 = vld [vmem:[#allocation8 + $0x78] sm:$0xff]   ;;  %315 = vmatprep.mubr.bf16.mxu0 %v687_v15  ;;  %v690_v19 = vld [vmem:[#allocation8 + $0x70] sm:$0xff]   ;;  %v692_v21 = vld [vmem:[#allocation8 + $0x68] sm:$0xff]   ;;  %v104_v51 = vshrl.u32 %v103_v50, 7 }
  0x2d   :  { %287 = vmatprep.subr.bf16.mxu0 %v643_v4  ;;  %v689_v17 = vld [vmem:[#allocation8 + $0x38] sm:$0xff]   ;;  %607 = vmatprep.subr.bf16.mxu1 %v688_v16  ;;  %v691_v20 = vld [vmem:[#allocation8 + $0x30] sm:$0xff]   ;;  %v693_v24 = vld [vmem:[#allocation8 + $0x28] sm:$0xff]  }
  0x2e   :  { %608 = vmatpush3.bf16.msra.mxu1 %v689_v17  ;;  %v661_v22 = vld [vmem:[#allocation6 + $0xf4] ss:$8 sps:$4 sm:$0xff]   ;;  %v663_v23 = vld [vmem:[#allocation6 + $0xf0] ss:$8 sps:$4 sm:$0xff]   ;;  %v694_v25 = vld [vmem:[#allocation8 + $0x60] sm:$0xff]   ;;  %v109_v52 = vsub.s32 1, %v104_v51 }
  0x2f   :  { %609 = vmatprep.subr.bf16.mxu1 %v690_v19  ;;  %v664_v26 = vld [vmem:[#allocation6 + $0xe4] ss:$8 sps:$4 sm:$0xff]   ;;  %v666_v28 = vld [vmem:[#allocation6 + $0xe0] ss:$8 sps:$4 sm:$0xff]   ;;  %v696_v29 = vld [vmem:[#allocation8 + $0x58] sm:$0xff]   ;;  %v105_v53 = vsub.s32 0, %v104_v51 }
  0x30   :  { %288 = vmatpush1.bf16.msra.mxu0 %v645_v5  ;;  %v695_v27 = vld [vmem:[#allocation8 + $0x20] sm:$0xff]   ;;  %v667_v30 = vld [vmem:[#allocation6 + $0xd4] ss:$8 sps:$4 sm:$0xff]   ;;  %v669_v32 = vld [vmem:[#allocation6 + $0xd0] ss:$8 sps:$4 sm:$0xff]  }
  0x31   :  { %289 = vmatprep.subr.bf16.mxu0 %v646_v6  ;;  %v697_v31 = vld [vmem:[#allocation8 + $0x18] sm:$0xff]   ;;  %v670_v33 = vld [vmem:[#allocation6 + $0xc4] ss:$8 sps:$4 sm:$0xff]   ;;  %v672_v34 = vld [vmem:[#allocation6 + $0xc0] ss:$8 sps:$4 sm:$0xff]  }
  0x32   :  { %610 = vmatpush3.bf16.msra.mxu1 %v691_v20  ;;  %v673_v35 = vld [vmem:[#allocation6 + $0xb4] ss:$8 sps:$4 sm:$0xff]   ;;  %v675_v36 = vld [vmem:[#allocation6 + $0xb0] ss:$8 sps:$4 sm:$0xff]   ;;  %v676_v37 = vld [vmem:[#allocation6 + $0xa4] ss:$8 sps:$4 sm:$0xff]  }
  0x33   :  { %611 = vmatprep.subr.bf16.mxu1 %v692_v21  ;;  %v678_v38 = vld [vmem:[#allocation6 + $0xa0] ss:$8 sps:$4 sm:$0xff]   ;;  %v679_v39 = vld [vmem:[#allocation6 + $0x94] ss:$8 sps:$4 sm:$0xff]   ;;  %v681_v40 = vld [vmem:[#allocation6 + $0x90] ss:$8 sps:$4 sm:$0xff]  }
  0x34   :  { %290 = vmatpush1.bf16.msra.mxu0 %v648_v7  ;;  %v682_v41 = vld [vmem:[#allocation6 + $0x84] ss:$8 sps:$4 sm:$0xff]   ;;  %v684_v42 = vld [vmem:[#allocation6 + $0x80] ss:$8 sps:$4 sm:$0xff]   ;;  %v685_v43 = vld [vmem:[#allocation3] ss:$8 sps:$4 sm:$0xff]  }
  0x35   :  { %291 = vmatprep.subr.bf16.mxu0 %v649_v8  ;;  %v698_v44 = vld [vmem:[#allocation8 + $0x50] sm:$0xff]   ;;  %v700_v46 = vld [vmem:[#allocation8 + $0x48] sm:$0xff]   ;;  %v702_v48 = vld [vmem:[#allocation8 + $0x40] sm:$0xff]  }
  0x36   :  { %612 = vmatpush3.bf16.msra.mxu1 %v693_v24  ;;  %v699_v45 = vld [vmem:[#allocation8 + $0x10] sm:$0xff]   ;;  %v701_v47 = vld [vmem:[#allocation8 + $0x8] sm:$0xff]   ;;  %v703_v49 = vld [vmem:[#allocation8] sm:$0xff]  }
  0x37   :  { %613 = vmatprep.subr.bf16.mxu1 %v694_v25  ;;  %v101_v55 = vld [vmem:[%s857_s2] sm:$0x3]  ;;  %s797_s2 = smov [#allocation9]  }
  0x38   :  { %292 = vmatpush1.bf16.msra.mxu0 %v651_v9  ;;  %v110_v57 = vrot.slane %v101_v55, %v109_v52  ;;  %v106_v58 = vrot.slane %v101_v55, %v105_v53  ;;  %v584_v4 = vld [vmem:[%s859_s4] ss:$0 sm:$0xff]  ;;  %s535_s13 = sshll.u32 %s797_s2, 4  ;;  %s536_s13 = int_to_ptr.vmem [resolvable:$true] %s535_s13 }
  0x39   :  { %293 = vmatprep.subr.bf16.mxu0 %v652_v10  ;;  %s764_s14 = scalar_lea.vmem %s536_s13, 256  ;;  %p769_p2 = scmp.lt.s32.totalorder %s536_s13, %s536_s13 }
  0x3a   :  { %614 = vmatpush3.bf16.msra.mxu1 %v695_v27  ;;  %p765_p1 = scmp.ne.s32.totalorder %s536_s13, %s764_s14  ;;  %p770_p3 = scmp.lt.s32.totalorder %s764_s14, %s764_s14 }
  0x3b   :  { %615 = vmatprep.subr.bf16.mxu1 %v696_v29 }
  0x3c   :  { %294 = vmatpush1.bf16.msra.mxu0 %v654_v11  ;;  %p771_p4 = por %p770_p3, %p769_p2 }
  0x3d   :  { %295 = vmatprep.subr.bf16.mxu0 %v655_v12 }
  0x3e   :  { %616 = vmatpush3.bf16.msra.mxu1 %v697_v31  ;;  %p772_p5 = pnand %p771_p4, %p765_p1 }
  0x3f   :  { %617 = vmatprep.subr.bf16.mxu1 %v698_v44 }
  0x40   :  { %296 = vmatpush1.bf16.msra.mxu0 %v657_v13 }
  0x41   :  { %297 = vmatprep.subr.bf16.mxu0 %v658_v14 }
  0x42   :  { %618 = vmatpush3.bf16.msra.mxu1 %v699_v45 }
  0x43   :  { %619 = vmatprep.subr.bf16.mxu1 %v700_v46 }
  0x44   :  { %298 = vmatpush1.bf16.msra.mxu0 %v660_v18 }
  0x45   :  { %299 = vmatprep.subr.bf16.mxu0 %v661_v22 }
  0x46   :  { %620 = vmatpush3.bf16.msra.mxu1 %v701_v47 }
  0x47   :  { %621 = vmatprep.subr.bf16.mxu1 %v702_v48 }
  0x48   :  { %300 = vmatpush2.bf16.msra.mxu0 %v663_v23 }
  0x49   :  { %301 = vmatprep.subr.bf16.mxu0 %v664_v26 }
  0x4a   :  { %622 = vmatpush3.bf16.msra.mxu1 %v703_v49 }
  0x4c   :  { %302 = vmatpush2.bf16.msra.mxu0 %v666_v28 }
  0x4d   :  { %303 = vmatprep.subr.bf16.mxu0 %v667_v30 }
  0x50   :  { %304 = vmatpush2.bf16.msra.mxu0 %v669_v32 }
  0x51   :  { %305 = vmatprep.subr.bf16.mxu0 %v670_v33 }
  0x54   :  { %306 = vmatpush2.bf16.msra.mxu0 %v672_v34 }
  0x55   :  { %307 = vmatprep.subr.bf16.mxu0 %v673_v35 }
  0x58   :  { %308 = vmatpush2.bf16.msra.mxu0 %v675_v36 }
  0x59   :  { %309 = vmatprep.subr.bf16.mxu0 %v676_v37 }
  0x5c   :  { %310 = vmatpush2.bf16.msra.mxu0 %v678_v38 }
  0x5d   :  { %311 = vmatprep.subr.bf16.mxu0 %v679_v39 }
  0x60   :  { %312 = vmatpush2.bf16.msra.mxu0 %v681_v40 }
  0x61   :  { %313 = vmatprep.subr.bf16.mxu0 %v682_v41 }
  0x64   :  { %314 = vmatpush2.bf16.msra.mxu0 %v684_v42 }
  0x67   :  { %316 = vmatmul.mubr.bf16.vlgmr.msra.gmra.mxu0 %v685_v43 }
 0x127   :  { %v317_v54 = vpop.f32.mrf.mxu0 }
 0x128   :  { %v318_v0 = vadd.f32 %v317_v54, %v106_v58 }
 0x129   :  { %v319_v56 = vpop.f32.mrf.mxu0 }
 0x12a   :  { %v320_v62 = vadd.f32 %v319_v56, %v110_v57 }
 0x12b   :  { %v321_v59 = vpop.f32.mrf.mxu0 }
 0x12c   :  { %v322_v60 = vadd.f32 %v321_v59, %v106_v58 }
 0x12d   :  { %v323_v61 = vpop.f32.mrf.mxu0 }
 0x12e   :  { %v324_v63 = vadd.f32 %v323_v61, %v110_v57  ;;  %v605_v2 = vpack.c.bf16 %v322_v60, %v318_v0 }
 0x130   :  { %v606_v1 = vpack.c.bf16 %v324_v63, %v320_v62 }
 0x132   :  { %519 = vmatprep.mubr.bf16.mxu1 %v606_v1 }
 0x133   :  { %520 = vmatmul.mubr.bf16.vlgmr.msra.gmra.mxu1 %v605_v2 }
 0x1f3   :  { %v623_v3 = vpop.f32.mrf.mxu1 }
 0x1f5   :  { %v624_v5 = vpop.f32.mrf.mxu1 }
 0x1f6   :  { %v625_v6 = vadd.f32 %v624_v5, %v623_v3 }
 0x1f7   :  { %v626_v7 = vpop.f32.mrf.mxu1 }
 0x1f8   :  { %v522_v8 = vadd.f32 %v625_v6, %v584_v4 }
 0x1f9   :  { %v627_v9 = vpop.f32.mrf.mxu1 }
 0x1fa   :  { %528 = vst [vmem:[#allocation9] sm:$0xff] %v522_v8  ;;  %v628_v10 = vadd.f32 %v627_v9, %v626_v7 }
 0x1fc   :  { %v525_v11 = vadd.f32 %v628_v10, %v584_v4 }
 0x1fe   :  { %529 = vst [vmem:[#allocation9 + $0x8] sm:$0xff] %v525_v11 }
 0x1ff   :  { %775 = shalt.err (!%p772_p5)
}
 0x200   :  { %541 = dma.vmem_to_hbm [thread:$0]  %s536_s13, 256, %s860_s5, [#allocation5], %s792_s23, %s792_s23, %s793_s24  }
 0x201   :  { %788 = dma.done.wait [#allocation5], 256  }
 0x202   :  { %789 = vsyncadd [#allocation5], 4294967040 }
 0x203   :  { %545 = vsyncpa [#allocation4], 1 }
 0x204   :  { %546 = vsyncpa [#allocation7], 1 }
 0x205   :  { %547 = vsyncpa [#allocation5], 1 }

// kernel: tpu_custom_call.1
= control target key start
LH: loop header
LB: loop body
LE: loop exit
PB: predicated region body
PF: predicated region fallthrough
CT: control target
= control target key end

     0   :  { %10 = vsyncpa [#allocation4], 0  ;;  %s855_s0 = inlined_call_operand.hbm [shape: bf16[16,256], index: 0, kind: input, shape index: {}]   ;;  %s856_s1 = inlined_call_operand.hbm [shape: bf16[256,256], index: 1, kind: input, shape index: {}]   ;;  %s857_s2 = inlined_call_operand.vmem [shape: f32[1,256], index: 2, kind: input, shape index: {}]   ;;  %s858_s3 = inlined_call_operand.hbm [shape: bf16[256,128], index: 3, kind: input, shape index: {}]   ;;  %s859_s4 = inlined_call_operand.vmem [shape: f32[1,128], index: 4, kind: input, shape index: {}]   ;;  %s860_s5 = inlined_call_operand.hbm [shape: f32[16,128], index: 5, kind: output, shape index: {}]  }
   0x1   :  { %11 = vsyncpa [#allocation7], 0 }
   0x2   :  { %12 = vsyncpa [#allocation5], 0  ;;  %s790_s18 = smov [#allocation6]   ;;  %s791_s20 = smov [#allocation3]  }
   0x3   :  { %s30_s19 = sshll.u32 %s790_s18, 4  ;;  %s18_s21 = sshll.u32 %s791_s20, 4  ;;  %s31_s19 = int_to_ptr.vmem [resolvable:$true] %s30_s19  ;;  %s19_s21 = int_to_ptr.vmem [resolvable:$true] %s18_s21 }
   0x4   :  { %s712_s22 = scalar_lea.vmem %s31_s19, 4096  ;;  %p717_p1 = scmp.lt.s32.totalorder %s31_s19, %s31_s19 }
   0x5   :  { %p713_p0 = scmp.ne.s32.totalorder %s31_s19, %s712_s22  ;;  %p718_p2 = scmp.lt.s32.totalorder %s712_s22, %s712_s22 }
   0x7   :  { %p719_p3 = por %p718_p2, %p717_p1 }
   0x9   :  { %p720_p4 = pnand %p719_p3, %p713_p0 }
   0xb   :  { %723 = shalt.err (!%p720_p4)
}
   0xc   :  { %s792_s23 = smov 128   ;;  %s793_s24 = smov 8  }
   0xd   :  { %36 = dma.hbm_to_vmem [thread:$0]  %s856_s1, 4096, %s31_s19, [#allocation7], %s792_s23, %s792_s23, %s793_s24  }
   0xe   :  { %s732_s27 = scalar_lea.vmem %s19_s21, 256  ;;  %p737_p6 = scmp.lt.s32.totalorder %s19_s21, %s19_s21 }
   0xf   :  { %p733_p5 = scmp.ne.s32.totalorder %s19_s21, %s732_s27  ;;  %p738_p7 = scmp.lt.s32.totalorder %s732_s27, %s732_s27 }
  0x11   :  { %p739_p8 = por %p738_p7, %p737_p6 }
  0x13   :  { %p740_p9 = pnand %p739_p8, %p733_p5 }
  0x15   :  { %743 = shalt.err (!%p740_p9)
}
  0x16   :  { %24 = dma.hbm_to_vmem [thread:$0]  %s855_s0, 256, %s19_s21, [#allocation4], %s792_s23, %s792_s23, %s793_s24  }
  0x17   :  { %s794_s30 = smov [#allocation8]  }
  0x18   :  { %s44_s6 = sshll.u32 %s794_s30, 4  ;;  %s45_s6 = int_to_ptr.vmem [resolvable:$true] %s44_s6 }
  0x19   :  { %s752_s7 = scalar_lea.vmem %s45_s6, 2048  ;;  %p757_p11 = scmp.lt.s32.totalorder %s45_s6, %s45_s6 }
  0x1a   :  { %p753_p10 = scmp.ne.s32.totalorder %s45_s6, %s752_s7  ;;  %p758_p12 = scmp.lt.s32.totalorder %s752_s7, %s752_s7 }
  0x1c   :  { %p759_p13 = por %p758_p12, %p757_p11 }
  0x1e   :  { %p760_p0 = pnand %p759_p13, %p753_p10 }
  0x20   :  { %763 = shalt.err (!%p760_p0)
}
  0x21   :  { %s795_s1 = smov 64   ;;  %s796_s8 = smov 4  }
  0x22   :  { %50 = dma.hbm_to_vmem [thread:$0]  %s858_s3, 2048, %s45_s6, [#allocation7], %s795_s1, %s795_s1, %s796_s8  }
  0x23   :  { %784 = dma.done.wait [#allocation4], 256  }
  0x24   :  { %785 = vsyncadd [#allocation4], 4294967040 }
  0x25   :  { %786 = dma.done.wait [#allocation7], 6144  }
  0x26   :  { %787 = vsyncadd [#allocation7], 4294961152  ;;  %v637_v0 = vld [vmem:[#allocation6 + $0x74] ss:$8 sps:$4 sm:$0xff]   ;;  %v639_v1 = vld [vmem:[#allocation6 + $0x70] ss:$8 sps:$4 sm:$0xff]   ;;  %v103_v50 = vlaneseq }
  0x27   :  { %283 = vmatprep.subr.bf16.mxu0 %v637_v0  ;;  %v640_v2 = vld [vmem:[#allocation6 + $0x64] ss:$8 sps:$4 sm:$0xff]   ;;  %v642_v3 = vld [vmem:[#allocation6 + $0x60] ss:$8 sps:$4 sm:$0xff]   ;;  %v643_v4 = vld [vmem:[#allocation6 + $0x54] ss:$8 sps:$4 sm:$0xff]  }
  0x28   :  { %284 = vmatpush1.bf16.msra.mxu0 %v639_v1  ;;  %v645_v5 = vld [vmem:[#allocation6 + $0x50] ss:$8 sps:$4 sm:$0xff]   ;;  %v646_v6 = vld [vmem:[#allocation6 + $0x44] ss:$8 sps:$4 sm:$0xff]   ;;  %v648_v7 = vld [vmem:[#allocation6 + $0x40] ss:$8 sps:$4 sm:$0xff]  }
  0x29   :  { %285 = vmatprep.subr.bf16.mxu0 %v640_v2  ;;  %v649_v8 = vld [vmem:[#allocation6 + $0x34] ss:$8 sps:$4 sm:$0xff]   ;;  %v651_v9 = vld [vmem:[#allocation6 + $0x30] ss:$8 sps:$4 sm:$0xff]   ;;  %v652_v10 = vld [vmem:[#allocation6 + $0x24] ss:$8 sps:$4 sm:$0xff]  }
  0x2a   :  { %v654_v11 = vld [vmem:[#allocation6 + $0x20] ss:$8 sps:$4 sm:$0xff]   ;;  %v655_v12 = vld [vmem:[#allocation6 + $0x14] ss:$8 sps:$4 sm:$0xff]   ;;  %v657_v13 = vld [vmem:[#allocation6 + $0x10] ss:$8 sps:$4 sm:$0xff]  }
  0x2b   :  { %v658_v14 = vld [vmem:[#allocation6 + $0x4] ss:$8 sps:$4 sm:$0xff]   ;;  %v687_v15 = vld [vmem:[#allocation3 + $0x4] ss:$8 sps:$4 sm:$0xff]   ;;  %v660_v18 = vld [vmem:[#allocation6] ss:$8 sps:$4 sm:$0xff]  }
  0x2c   :  { %286 = vmatpush1.bf16.msra.mxu0 %v642_v3  ;;  %v688_v16 = vld [vmem:[#allocation8 + $0x78] sm:$0xff]   ;;  %315 = vmatprep.mubr.bf16.mxu0 %v687_v15  ;;  %v690_v19 = vld [vmem:[#allocation8 + $0x70] sm:$0xff]   ;;  %v692_v21 = vld [vmem:[#allocation8 + $0x68] sm:$0xff]   ;;  %v104_v51 = vshrl.u32 %v103_v50, 7 }
  0x2d   :  { %287 = vmatprep.subr.bf16.mxu0 %v643_v4  ;;  %v689_v17 = vld [vmem:[#allocation8 + $0x38] sm:$0xff]   ;;  %607 = vmatprep.subr.bf16.mxu1 %v688_v16  ;;  %v691_v20 = vld [vmem:[#allocation8 + $0x30] sm:$0xff]   ;;  %v693_v24 = vld [vmem:[#allocation8 + $0x28] sm:$0xff]  }
  0x2e   :  { %608 = vmatpush3.bf16.msra.mxu1 %v689_v17  ;;  %v661_v22 = vld [vmem:[#allocation6 + $0xf4] ss:$8 sps:$4 sm:$0xff]   ;;  %v663_v23 = vld [vmem:[#allocation6 + $0xf0] ss:$8 sps:$4 sm:$0xff]   ;;  %v694_v25 = vld [vmem:[#allocation8 + $0x60] sm:$0xff]   ;;  %v109_v52 = vsub.s32 1, %v104_v51 }
  0x2f   :  { %609 = vmatprep.subr.bf16.mxu1 %v690_v19  ;;  %v664_v26 = vld [vmem:[#allocation6 + $0xe4] ss:$8 sps:$4 sm:$0xff]   ;;  %v666_v28 = vld [vmem:[#allocation6 + $0xe0] ss:$8 sps:$4 sm:$0xff]   ;;  %v696_v29 = vld [vmem:[#allocation8 + $0x58] sm:$0xff]   ;;  %v105_v53 = vsub.s32 0, %v104_v51 }
  0x30   :  { %288 = vmatpush1.bf16.msra.mxu0 %v645_v5  ;;  %v695_v27 = vld [vmem:[#allocation8 + $0x20] sm:$0xff]   ;;  %v667_v30 = vld [vmem:[#allocation6 + $0xd4] ss:$8 sps:$4 sm:$0xff]   ;;  %v669_v32 = vld [vmem:[#allocation6 + $0xd0] ss:$8 sps:$4 sm:$0xff]  }
  0x31   :  { %289 = vmatprep.subr.bf16.mxu0 %v646_v6  ;;  %v697_v31 = vld [vmem:[#allocation8 + $0x18] sm:$0xff]   ;;  %v670_v33 = vld [vmem:[#allocation6 + $0xc4] ss:$8 sps:$4 sm:$0xff]   ;;  %v672_v34 = vld [vmem:[#allocation6 + $0xc0] ss:$8 sps:$4 sm:$0xff]  }
  0x32   :  { %610 = vmatpush3.bf16.msra.mxu1 %v691_v20  ;;  %v673_v35 = vld [vmem:[#allocation6 + $0xb4] ss:$8 sps:$4 sm:$0xff]   ;;  %v675_v36 = vld [vmem:[#allocation6 + $0xb0] ss:$8 sps:$4 sm:$0xff]   ;;  %v676_v37 = vld [vmem:[#allocation6 + $0xa4] ss:$8 sps:$4 sm:$0xff]  }
  0x33   :  { %611 = vmatprep.subr.bf16.mxu1 %v692_v21  ;;  %v678_v38 = vld [vmem:[#allocation6 + $0xa0] ss:$8 sps:$4 sm:$0xff]   ;;  %v679_v39 = vld [vmem:[#allocation6 + $0x94] ss:$8 sps:$4 sm:$0xff]   ;;  %v681_v40 = vld [vmem:[#allocation6 + $0x90] ss:$8 sps:$4 sm:$0xff]  }
  0x34   :  { %290 = vmatpush1.bf16.msra.mxu0 %v648_v7  ;;  %v682_v41 = vld [vmem:[#allocation6 + $0x84] ss:$8 sps:$4 sm:$0xff]   ;;  %v684_v42 = vld [vmem:[#allocation6 + $0x80] ss:$8 sps:$4 sm:$0xff]   ;;  %v685_v43 = vld [vmem:[#allocation3] ss:$8 sps:$4 sm:$0xff]  }
  0x35   :  { %291 = vmatprep.subr.bf16.mxu0 %v649_v8  ;;  %v698_v44 = vld [vmem:[#allocation8 + $0x50] sm:$0xff]   ;;  %v700_v46 = vld [vmem:[#allocation8 + $0x48] sm:$0xff]   ;;  %v702_v48 = vld [vmem:[#allocation8 + $0x40] sm:$0xff]  }
  0x36   :  { %612 = vmatpush3.bf16.msra.mxu1 %v693_v24  ;;  %v699_v45 = vld [vmem:[#allocation8 + $0x10] sm:$0xff]   ;;  %v701_v47 = vld [vmem:[#allocation8 + $0x8] sm:$0xff]   ;;  %v703_v49 = vld [vmem:[#allocation8] sm:$0xff]  }
  0x37   :  { %613 = vmatprep.subr.bf16.mxu1 %v694_v25  ;;  %v101_v55 = vld [vmem:[%s857_s2] sm:$0x3]  ;;  %s797_s2 = smov [#allocation9]  }
  0x38   :  { %292 = vmatpush1.bf16.msra.mxu0 %v651_v9  ;;  %v110_v57 = vrot.slane %v101_v55, %v109_v52  ;;  %v106_v58 = vrot.slane %v101_v55, %v105_v53  ;;  %v584_v4 = vld [vmem:[%s859_s4] ss:$0 sm:$0xff]  ;;  %s535_s13 = sshll.u32 %s797_s2, 4  ;;  %s536_s13 = int_to_ptr.vmem [resolvable:$true] %s535_s13 }
  0x39   :  { %293 = vmatprep.subr.bf16.mxu0 %v652_v10  ;;  %s764_s14 = scalar_lea.vmem %s536_s13, 256  ;;  %p769_p2 = scmp.lt.s32.totalorder %s536_s13, %s536_s13 }
  0x3a   :  { %614 = vmatpush3.bf16.msra.mxu1 %v695_v27  ;;  %p765_p1 = scmp.ne.s32.totalorder %s536_s13, %s764_s14  ;;  %p770_p3 = scmp.lt.s32.totalorder %s764_s14, %s764_s14 }
  0x3b   :  { %615 = vmatprep.subr.bf16.mxu1 %v696_v29 }
  0x3c   :  { %294 = vmatpush1.bf16.msra.mxu0 %v654_v11  ;;  %p771_p4 = por %p770_p3, %p769_p2 }
  0x3d   :  { %295 = vmatprep.subr.bf16.mxu0 %v655_v12 }
  0x3e   :  { %616 = vmatpush3.bf16.msra.mxu1 %v697_v31  ;;  %p772_p5 = pnand %p771_p4, %p765_p1 }
  0x3f   :  { %617 = vmatprep.subr.bf16.mxu1 %v698_v44 }
  0x40   :  { %296 = vmatpush1.bf16.msra.mxu0 %v657_v13 }
  0x41   :  { %297 = vmatprep.subr.bf16.mxu0 %v658_v14 }
  0x42   :  { %618 = vmatpush3.bf16.msra.mxu1 %v699_v45 }
  0x43   :  { %619 = vmatprep.subr.bf16.mxu1 %v700_v46 }
  0x44   :  { %298 = vmatpush1.bf16.msra.mxu0 %v660_v18 }
  0x45   :  { %299 = vmatprep.subr.bf16.mxu0 %v661_v22 }
  0x46   :  { %620 = vmatpush3.bf16.msra.mxu1 %v701_v47 }
  0x47   :  { %621 = vmatprep.subr.bf16.mxu1 %v702_v48 }
  0x48   :  { %300 = vmatpush2.bf16.msra.mxu0 %v663_v23 }
  0x49   :  { %301 = vmatprep.subr.bf16.mxu0 %v664_v26 }
  0x4a   :  { %622 = vmatpush3.bf16.msra.mxu1 %v703_v49 }
  0x4c   :  { %302 = vmatpush2.bf16.msra.mxu0 %v666_v28 }
  0x4d   :  { %303 = vmatprep.subr.bf16.mxu0 %v667_v30 }
  0x50   :  { %304 = vmatpush2.bf16.msra.mxu0 %v669_v32 }
  0x51   :  { %305 = vmatprep.subr.bf16.mxu0 %v670_v33 }
  0x54   :  { %306 = vmatpush2.bf16.msra.mxu0 %v672_v34 }
  0x55   :  { %307 = vmatprep.subr.bf16.mxu0 %v673_v35 }
  0x58   :  { %308 = vmatpush2.bf16.msra.mxu0 %v675_v36 }
  0x59   :  { %309 = vmatprep.subr.bf16.mxu0 %v676_v37 }
  0x5c   :  { %310 = vmatpush2.bf16.msra.mxu0 %v678_v38 }
  0x5d   :  { %311 = vmatprep.subr.bf16.mxu0 %v679_v39 }
  0x60   :  { %312 = vmatpush2.bf16.msra.mxu0 %v681_v40 }
  0x61   :  { %313 = vmatprep.subr.bf16.mxu0 %v682_v41 }
  0x64   :  { %314 = vmatpush2.bf16.msra.mxu0 %v684_v42 }
  0x67   :  { %316 = vmatmul.mubr.bf16.vlgmr.msra.gmra.mxu0 %v685_v43 }
 0x127   :  { %v317_v54 = vpop.f32.mrf.mxu0 }
 0x128   :  { %v318_v0 = vadd.f32 %v317_v54, %v106_v58 }
 0x129   :  { %v319_v56 = vpop.f32.mrf.mxu0 }
 0x12a   :  { %v320_v62 = vadd.f32 %v319_v56, %v110_v57 }
 0x12b   :  { %v321_v59 = vpop.f32.mrf.mxu0 }
 0x12c   :  { %v322_v60 = vadd.f32 %v321_v59, %v106_v58 }
 0x12d   :  { %v323_v61 = vpop.f32.mrf.mxu0 }
 0x12e   :  { %v324_v63 = vadd.f32 %v323_v61, %v110_v57  ;;  %v605_v2 = vpack.c.bf16 %v322_v60, %v318_v0 }
 0x130   :  { %v606_v1 = vpack.c.bf16 %v324_v63, %v320_v62 }
 0x132   :  { %519 = vmatprep.mubr.bf16.mxu1 %v606_v1 }
 0x133   :  { %520 = vmatmul.mubr.bf16.vlgmr.msra.gmra.mxu1 %v605_v2 }
 0x1f3   :  { %v623_v3 = vpop.f32.mrf.mxu1 }
 0x1f5   :  { %v624_v5 = vpop.f32.mrf.mxu1 }
 0x1f6   :  { %v625_v6 = vadd.f32 %v624_v5, %v623_v3 }
 0x1f7   :  { %v626_v7 = vpop.f32.mrf.mxu1 }
 0x1f8   :  { %v522_v8 = vadd.f32 %v625_v6, %v584_v4 }
 0x1f9   :  { %v627_v9 = vpop.f32.mrf.mxu1 }
 0x1fa   :  { %528 = vst [vmem:[#allocation9] sm:$0xff] %v522_v8  ;;  %v628_v10 = vadd.f32 %v627_v9, %v626_v7 }
 0x1fc   :  { %v525_v11 = vadd.f32 %v628_v10, %v584_v4 }
 0x1fe   :  { %529 = vst [vmem:[#allocation9 + $0x8] sm:$0xff] %v525_v11 }
 0x1ff   :  { %775 = shalt.err (!%p772_p5)
}
 0x200   :  { %541 = dma.vmem_to_hbm [thread:$0]  %s536_s13, 256, %s860_s5, [#allocation5], %s792_s23, %s792_s23, %s793_s24  }
 0x201   :  { %788 = dma.done.wait [#allocation5], 256  }
 0x202   :  { %789 = vsyncadd [#allocation5], 4294967040 }
 0x203   :  { %545 = vsyncpa [#allocation4], 1 }
 0x204   :  { %546 = vsyncpa [#allocation7], 1 }
 0x205   :  { %547 = vsyncpa [#allocation5], 1 }

</bundles_post_ra>
